<compile_context>
chip_gen: v6e
topology: v6e:2x2x1
jax: 0.10.0
libtpu: 0.0.40
codegen_flags: <defaults>
</compile_context>

<pallas_src>
import functools

import jax
import jax.numpy as jnp
from jax.experimental import pallas as pl
from jax.experimental.pallas import tpu as pltpu


def _round_up(n, m):
    return ((n + m - 1) // m) * m


def _largest_divisor_leq(n, cap, multiple_of=1):
    """Largest divisor of n that is <= cap and a multiple of `multiple_of`."""
    start = (min(n, cap) // multiple_of) * multiple_of
    for t in range(start, 0, -multiple_of):
        if n % t == 0:
            return t
    return None


def _masked_avg_pool_kernel(x_ref, keep_ref, len_ref, o_ref, acc_ref):
    # x_ref:    (BB, TS, TD)   input tile
    # keep_ref: (BB, 1,  TS)   1.0 for valid tokens, 0.0 for padding (x.dtype)
    # len_ref:  (BB, 1,  1)    clamped valid-token count, f32
    # o_ref:    (BB, 1,  TD)   output tile (written only at the last seq step)
    # acc_ref:  (BB, 1,  TD)   f32 running masked sum over seq
    k = pl.program_id(2)

    @pl.when(k == 0)
    def _init():
        acc_ref[...] = jnp.zeros_like(acc_ref)

    # Mask-apply + seq-reduce in one batched MXU matmul (frees VPU/XLU slots,
    # native bf16 -> f32 accumulation).
    acc_ref[...] += jnp.einsum(
        "bqs,bsd->bqd", keep_ref[...], x_ref[...],
        preferred_element_type=jnp.float32)

    @pl.when(k == pl.num_programs(2) - 1)
    def _finalize():
        # Exact divide for bit-level parity with the reference; output-sized
        # work only (pl.reciprocal(approx=True) would be the EUP alternative).
        o_ref[...] = (acc_ref[...] / len_ref[...]).astype(o_ref.dtype)


def _choose_tiles(B, S, TD, itemsize, target_bytes):
    """Pick (BB, TS, Bp, Sp) so one x block is ~target_bytes of *actual* VMEM.

    TS is a multiple of 128 when < S (keep's lane constraint); BB is a leading
    dim so it needs no alignment.  Bp/Sp != B/S only in rare fallback cases.
    """
    sub = 8 * max(1, 4 // itemsize)                  # sublane quantum of x dtype
    row_bytes = _round_up(TD, 128) * itemsize        # VMEM bytes of one (1,1,TD) row

    # ---- seq tile ----
    ts_cap_rows = max(1, target_bytes // row_bytes)
    if S <= ts_cap_rows or S <= 128:
        TS, Sp = S, S                                # whole sequence per step
    else:
        ts_cap = max(128, (min(ts_cap_rows, S) // 128) * 128)
        ts = _largest_divisor_leq(S, ts_cap, multiple_of=128)
        if ts is not None and ts * 8 >= ts_cap:
            TS, Sp = ts, S                           # divides S: no padding
        else:
            TS = ts_cap                              # rare fallback: pad seq
            Sp = _round_up(S, TS)

    # ---- batch tile (leading dim: no alignment constraint) ----
    blk_bytes = _round_up(TS, sub) * row_bytes       # one (1, TS, TD) slab
    bb_cap = max(1, target_bytes // blk_bytes)
    if B <= bb_cap:
        BB, Bp = B, B
    else:
        bb = _largest_divisor_leq(B, bb_cap)
        if bb is not None and bb * 4 >= bb_cap:
            BB, Bp = bb, B                           # divides B: no padding
        else:
            BB = bb_cap                              # rare fallback: pad batch
            Bp = _round_up(B, BB)
    return BB, TS, Bp, Sp


@functools.partial(jax.jit, static_argnames=("keepdim", "target_block_bytes"))
def masked_average_pooling(x, mask, keepdim=False, *,
                           target_block_bytes=4 * 1024 * 1024):
    """
    x:    [batch, seq, dim] float array
    mask: [batch, seq] bool array; True == padding token
    returns [batch, dim] (or [batch, 1, dim] if keepdim)
    """
    B, S, D = x.shape
    itemsize = jnp.dtype(x.dtype).itemsize

    # Tile choice; if the batch gives only one parallel block, split D so
    # dual-TensorCore chips (v7x) still get two parallel blocks.
    nd, TD = 1, D
    BB, TS, Bp, Sp = _choose_tiles(B, S, TD, itemsize, target_block_bytes)
    if (Bp // BB) < 2 and D % 256 == 0:
        nd, TD = 2, D // 2
        BB, TS, Bp, Sp = _choose_tiles(B, S, TD, itemsize, target_block_bytes)

    # keep[b, 0, s] = 1 for valid tokens, 0 for padding (lane-dense layout).
    keep = jnp.logical_not(mask).astype(x.dtype)[:, None, :]            # [B,1,S]
    # Clamped valid-token counts, computed once in the wrapper (f32).
    lens = jnp.maximum(S - jnp.sum(mask.astype(jnp.float32), axis=1),
                       1.0)[:, None, None]                              # [B,1,1]

    # Rare fallbacks only (prime-ish S or B): these materialize a padded copy
    # of x in HBM, so the tile search above avoids them whenever possible.
    if Sp != S:
        x = jnp.pad(x, ((0, 0), (0, Sp - S), (0, 0)))
        keep = jnp.pad(keep, ((0, 0), (0, 0), (0, Sp - S)))
    if Bp != B:
        x = jnp.pad(x, ((0, Bp - B), (0, 0), (0, 0)))
        keep = jnp.pad(keep, ((0, Bp - B), (0, 0), (0, 0)))
        lens = jnp.pad(lens, ((0, Bp - B), (0, 0), (0, 0)), constant_values=1.0)

    grid = (Bp // BB, nd, Sp // TS)   # reduction (seq) axis last

    out = pl.pallas_call(
        _masked_avg_pool_kernel,
        out_shape=jax.ShapeDtypeStruct((Bp, 1, D), x.dtype),
        grid_spec=pltpu.PrefetchScalarGridSpec(
            num_scalar_prefetch=0,
            grid=grid,
            in_specs=[
                pl.BlockSpec((BB, TS, TD), lambda b, d, k: (b, k, d)),
                pl.BlockSpec((BB, 1, TS), lambda b, d, k: (b, 0, k)),
                pl.BlockSpec((BB, 1, 1), lambda b, d, k: (b, 0, 0)),
            ],
            out_specs=pl.BlockSpec((BB, 1, TD), lambda b, d, k: (b, 0, d)),
            scratch_shapes=[
                pltpu.VMEM((BB, 1, TD), jnp.float32),   # running masked sum
            ],
        ),
        compiler_params=pltpu.CompilerParams(
            dimension_semantics=("parallel", "parallel", "arbitrary"),
            vmem_limit_bytes=32 * 1024 * 1024,
        ),
    )(x, keep, lens)

    out = out[:B]                 # (B, 1, D)
    return out if keepdim else out[:, 0, :]


def _reference(x, mask, keepdim=False):
    # Pure-JAX reference matching the PyTorch forward exactly.
    mask_f = mask.astype(jnp.float32)
    x_masked = jnp.where(mask[:, :, None], 0.0, x)
    seq_lengths = mask.shape[1] - jnp.sum(mask_f, axis=1, keepdims=True)
    seq_lengths = jnp.maximum(seq_lengths, 1.0)   # clamp(min=1)
    avg = jnp.sum(x_masked, axis=1) / seq_lengths
    if keepdim:
        avg = avg[:, None, :]
    return avg


if __name__ == "__main__":
    key = jax.random.PRNGKey(0)
    kx, km, kx2, km2, kx3, km3 = jax.random.split(key, 6)

    # --- small shapes matching the module: batch=2, seq=8, dim=32 ---
    B, S, D = 2, 8, 32
    x = jax.random.normal(kx, (B, S, D), dtype=jnp.float32)
    mask = jax.random.bernoulli(km, p=0.4, shape=(B, S))
    mask = mask.at[1, :].set(True)           # fully padded row -> clamp(min=1) path

    out = jax.block_until_ready(masked_average_pooling(x, mask))
    ref = _reference(x, mask)
    assert out.shape == (B, D)
    assert jnp.allclose(out, ref, atol=1e-5, rtol=1e-5)

    out_kd = jax.block_until_ready(masked_average_pooling(x, mask, keepdim=True))
    ref_kd = _reference(x, mask, keepdim=True)
    assert out_kd.shape == (B, 1, D)
    assert jnp.allclose(out_kd, ref_kd, atol=1e-5, rtol=1e-5)

    # --- larger shapes + tiny tile target: multi-step seq reduction (nk=4) and
    #     multi-block batch (BB=1, nb=5), all without any padding of x ---
    B2, S2, D2 = 5, 512, 128
    x2 = jax.random.normal(kx2, (B2, S2, D2), dtype=jnp.float32)
    mask2 = jax.random.bernoulli(km2, p=0.3, shape=(B2, S2))
    out2 = jax.block_until_ready(
        masked_average_pooling(x2, mask2, target_block_bytes=64 * 1024))
    ref2 = _reference(x2, mask2)
    assert out2.shape == (B2, D2)
    assert jnp.allclose(out2, ref2, atol=1e-4, rtol=1e-4)

    # --- bf16 path: bf16 operands on the MXU, f32 accumulation in scratch ---
    x2b = x2.astype(jnp.bfloat16)
    out3 = jax.block_until_ready(masked_average_pooling(x2b, mask2))
    ref3 = _reference(x2b.astype(jnp.float32), mask2)
    assert out3.shape == (B2, D2)
    assert jnp.allclose(out3.astype(jnp.float32), ref3, atol=2e-2, rtol=2e-2)

    # --- D % 256 == 0, small batch: exercises the dim-split (nd=2) parallel path ---
    B4, S4, D4 = 2, 64, 256
    x4 = jax.random.normal(kx3, (B4, S4, D4), dtype=jnp.float32)
    mask4 = jax.random.bernoulli(km3, p=0.5, shape=(B4, S4))
    out4 = jax.block_until_ready(masked_average_pooling(x4, mask4))
    ref4 = _reference(x4, mask4)
    assert out4.shape == (B4, D4)
    assert jnp.allclose(out4, ref4, atol=1e-5, rtol=1e-5)

    print("KERNEL_OK")
</pallas_src>

<mosaic_0001>
module attributes {stable_mosaic.version = 11 : i64} {
  func.func @_masked_avg_pool_kernel(%arg0: i32, %arg1: i32, %arg2: i32, %arg3: memref<2x8x32xf32, #tpu.memory_space<vmem>>, %arg4: memref<2x1x8xf32, #tpu.memory_space<vmem>>, %arg5: memref<2x1x1xf32, #tpu.memory_space<vmem>>, %arg6: memref<2x1x32xf32, #tpu.memory_space<vmem>>, %arg7: memref<2x1x32xf32, #tpu.memory_space<vmem>>) attributes {dimension_semantics = [#tpu.dimension_semantics<parallel>, #tpu.dimension_semantics<parallel>, #tpu.dimension_semantics<arbitrary>], iteration_bounds = array<i64: 1, 1, 1>, scalar_prefetch = 0 : i64, scratch_operands = 1 : i64, tpu.core_type = #tpu.core_type<tc>, window_params = [{transform_indices = @transform_0, window_bounds = array<i64: 2, 8, 32>}, {transform_indices = @transform_1, window_bounds = array<i64: 2, 1, 8>}, {transform_indices = @transform_2, window_bounds = array<i64: 2, 1, 1>}, {transform_indices = @transform_3, window_bounds = array<i64: 2, 1, 32>}]} {
    %c0_i32 = arith.constant 0 : i32
    %0 = arith.cmpi eq, %arg2, %c0_i32 : i32
    %1 = arith.extui %0 : i1 to i32
    %c0_i32_0 = arith.constant 0 : i32
    %2 = arith.cmpi ne, %1, %c0_i32_0 : i32
    scf.if %2 {
      %cst_14 = arith.constant 0.000000e+00 : f32
      %12 = vector.broadcast %cst_14 : f32 to vector<2x1x32xf32>
      %c0_15 = arith.constant 0 : index
      %c0_16 = arith.constant 0 : index
      %c0_17 = arith.constant 0 : index
      %13 = vector.load %arg7[%c0_15, %c0_16, %c0_17] : memref<2x1x32xf32, #tpu.memory_space<vmem>>, vector<2x1x32xf32>
      tpu.vector_store %arg7[%c0_15, %c0_16, %c0_17], %12 {strides = array<i32>} : memref<2x1x32xf32, #tpu.memory_space<vmem>>, vector<2x1x32xf32>,
    } else {
    }
    %c0 = arith.constant 0 : index
    %c0_1 = arith.constant 0 : index
    %c0_2 = arith.constant 0 : index
    %3 = vector.load %arg7[%c0, %c0_1, %c0_2] : memref<2x1x32xf32, #tpu.memory_space<vmem>>, vector<2x1x32xf32>
    %c0_3 = arith.constant 0 : index
    %c0_4 = arith.constant 0 : index
    %c0_5 = arith.constant 0 : index
    %4 = vector.load %arg4[%c0_3, %c0_4, %c0_5] : memref<2x1x8xf32, #tpu.memory_space<vmem>>, vector<2x1x8xf32>
    %c0_6 = arith.constant 0 : index
    %c0_7 = arith.constant 0 : index
    %c0_8 = arith.constant 0 : index
    %5 = vector.load %arg3[%c0_6, %c0_7, %c0_8] : memref<2x8x32xf32, #tpu.memory_space<vmem>>, vector<2x8x32xf32>
    "tpu.trace_start"() <{level = 10 : i32, message = "bqs,bsd->bqd"}> : () -> ()
    %cst = arith.constant dense<0.000000e+00> : vector<2x1x32xf32>
    %6 = tpu.matmul %4, %5, %cst {dimension_numbers = #tpu.dot_dimension_numbers<[2], [1], [1], [2], [0, 0, 0, 1, 1, 2], [0], [0]>} : vector<2x1x8xf32>, vector<2x8x32xf32>, vector<2x1x32xf32> -> vector<2x1x32xf32>
    "tpu.trace_stop"() : () -> ()
    %7 = arith.addf %3, %6 : vector<2x1x32xf32>
    %c0_9 = arith.constant 0 : index
    %c0_10 = arith.constant 0 : index
    %c0_11 = arith.constant 0 : index
    %8 = vector.load %arg7[%c0_9, %c0_10, %c0_11] : memref<2x1x32xf32, #tpu.memory_space<vmem>>, vector<2x1x32xf32>
    tpu.vector_store %arg7[%c0_9, %c0_10, %c0_11], %7 {strides = array<i32>} : memref<2x1x32xf32, #tpu.memory_space<vmem>>, vector<2x1x32xf32>,
    %c0_i32_12 = arith.constant 0 : i32
    %9 = arith.cmpi eq, %arg2, %c0_i32_12 : i32
    %10 = arith.extui %9 : i1 to i32
    %c0_i32_13 = arith.constant 0 : i32
    %11 = arith.cmpi ne, %10, %c0_i32_13 : i32
    scf.if %11 {
      %c0_14 = arith.constant 0 : index
      %c0_15 = arith.constant 0 : index
      %c0_16 = arith.constant 0 : index
      %12 = vector.load %arg7[%c0_14, %c0_15, %c0_16] : memref<2x1x32xf32, #tpu.memory_space<vmem>>, vector<2x1x32xf32>
      %c0_17 = arith.constant 0 : index
      %c0_18 = arith.constant 0 : index
      %c0_19 = arith.constant 0 : index
      %13 = vector.load %arg5[%c0_17, %c0_18, %c0_19] : memref<2x1x1xf32, #tpu.memory_space<vmem>>, vector<2x1x1xf32>
      %14 = vector.broadcast %13 : vector<2x1x1xf32> to vector<2x1x32xf32>
      %15 = arith.divf %12, %14 : vector<2x1x32xf32>
      %c0_20 = arith.constant 0 : index
      %c0_21 = arith.constant 0 : index
      %c0_22 = arith.constant 0 : index
      %16 = vector.load %arg6[%c0_20, %c0_21, %c0_22] : memref<2x1x32xf32, #tpu.memory_space<vmem>>, vector<2x1x32xf32>
      tpu.vector_store %arg6[%c0_20, %c0_21, %c0_22], %15 {strides = array<i32>} : memref<2x1x32xf32, #tpu.memory_space<vmem>>, vector<2x1x32xf32>,
    } else {
    }
    return
  }
  func.func @transform_0(%arg0: i32, %arg1: i32, %arg2: i32) -> (i32, i32, i32) {
    %c0_i32 = arith.constant 0 : i32
    return %arg0, %arg2, %arg1 : i32, i32, i32
  }
  func.func @transform_1(%arg0: i32, %arg1: i32, %arg2: i32) -> (i32, i32, i32) {
    %c0_i32 = arith.constant 0 : i32
    %c0_i32_0 = arith.constant 0 : i32
    return %arg0, %c0_i32, %arg2 : i32, i32, i32
  }
  func.func @transform_2(%arg0: i32, %arg1: i32, %arg2: i32) -> (i32, i32, i32) {
    %c0_i32 = arith.constant 0 : i32
    %c0_i32_0 = arith.constant 0 : i32
    %c0_i32_1 = arith.constant 0 : i32
    return %arg0, %c0_i32, %c0_i32_0 : i32, i32, i32
  }
  func.func @transform_3(%arg0: i32, %arg1: i32, %arg2: i32) -> (i32, i32, i32) {
    %c0_i32 = arith.constant 0 : i32
    %c0_i32_0 = arith.constant 0 : i32
    return %arg0, %c0_i32, %arg1 : i32, i32, i32
  }
}

</mosaic_0001>

<bundles_post_ra>
// kernel: masked_average_pooling.1
= control target key start
LH: loop header
LB: loop body
LE: loop exit
PB: predicated region body
PF: predicated region fallthrough
CT: control target
= control target key end

     0   :  { %8 = vsyncpa [#allocation4], 0  ;;  %s369_s0 = inlined_call_operand.hbm [shape: f32[2,8,32], index: 0, kind: input, shape index: {}]   ;;  %s370_s1 = inlined_call_operand.vmem [shape: f32[2,1,8], index: 1, kind: input, shape index: {}]   ;;  %s371_s2 = inlined_call_operand.vmem [shape: f32[2,1,1], index: 2, kind: input, shape index: {}]   ;;  %s372_s3 = inlined_call_operand.hbm [shape: f32[2,1,32], index: 3, kind: output, shape index: {}]  }
   0x1   :  { %9 = vsyncpa [#allocation5], 0  ;;  %s316_s12 = smov [#allocation3]  }
   0x2   :  { %s15_s13 = sshll.u32 %s316_s12, 4  ;;  %s16_s13 = int_to_ptr.vmem [resolvable:$true] %s15_s13 }
   0x3   :  { %s280_s14 = scalar_lea.vmem %s16_s13, 256  ;;  %p285_p1 = scmp.lt.s32.totalorder %s16_s13, %s16_s13 }
   0x4   :  { %p281_p0 = scmp.ne.s32.totalorder %s16_s13, %s280_s14  ;;  %p286_p2 = scmp.lt.s32.totalorder %s280_s14, %s280_s14 }
   0x6   :  { %p287_p3 = por %p286_p2, %p285_p1 }
   0x8   :  { %p288_p4 = pnand %p287_p3, %p281_p0 }
   0xa   :  { %291 = shalt.err (!%p288_p4)
}
   0xb   :  { %s317_s15 = smov 128   ;;  %s318_s16 = smov 8  }
   0xc   :  { %21 = dma.hbm_to_vmem [thread:$0]  %s369_s0, 256, %s16_s13, [#allocation4], %s317_s15, %s317_s15, %s318_s16  }
   0xd   :  { %312 = dma.done.wait [#allocation4], 256  }
   0xe   :  { %313 = vsyncadd [#allocation4], 4294967040  ;;  %v319_v0 = vmov 0.0   ;;  %vm320_vm0 = vmmov 0   ;;  %v321_v1 = vmov 0   ;;  %vm42_vm1 = vcmask 64512  }
   0xf   :  { %248 = vmatprep.subr.mxu0 %v319_v0  ;;  %253 = vmatprep.subr.mxu1 %v319_v0  ;;  %v40_v2 = vld [vmem:[#allocation3] sm:$0xff]  ;;  %v41_v3 = vld [vmem:[#allocation3 + $0x8] sm:$0xff]  ;;  %v38_v4 = vld [vmem:[%s370_s1] sm:$0x1]  ;;  %vm33_vm2 = vcmask 253952   ;;  %v206_v8 = vlaneseq }
  0x10   :  { %250 = vmatprep.mubr.msk.f32.mxu0 %vm320_vm0, %v319_v0  ;;  %255 = vmatprep.mubr.msk.f32.mxu1 %vm320_vm0, %v319_v0  ;;  %v39_v5 = vld [vmem:[%s370_s1 + $0x1] sm:$0x1]  ;;  %v199_v6 = vld [vmem:[%s371_s2] sm:$0x1]  ;;  %34 = vst.msk [vmem:[#allocation2] sm:$0x1] %vm33_vm2, %v319_v0 }
  0x11   :  { %267 = vset.pattern.permute.xlu0 %v321_v1  ;;  %249 = vmatpush3.msra.mxu0 %v40_v2  ;;  %v200_v7 = vld [vmem:[%s371_s2 + $0x1] sm:$0x1]  ;;  %35 = vst.msk [vmem:[#allocation2 + $0x1] sm:$0x1] %vm33_vm2, %v319_v0  ;;  %v207_v9 = vshrl.u32 %v206_v8, 7  ;;  %s322_s1 = smov [#allocation6]  }
  0x12   :  { %254 = vmatpush3.msra.mxu1 %v41_v3  ;;  %251 = vmatmul.mubr.msk.f32.vlgmr.msra.gmra.mxu0 %vm42_vm1, %v38_v4  ;;  %s230_s2 = sshll.u32 %s322_s1, 4  ;;  %s231_s2 = int_to_ptr.vmem [resolvable:$true] %s230_s2 }
  0x13   :  { %256 = vmatmul.mubr.msk.f32.vlgmr.msra.gmra.mxu1 %vm42_vm1, %v39_v5  ;;  %203 = vperm.xlu0 %267, %v199_v6   ;;  %v208_v11 = vsub.s32 0, %v207_v9  ;;  %s292_s26 = scalar_lea.vmem %s231_s2, 32  ;;  %p297_p6 = scmp.lt.s32.totalorder %s231_s2, %s231_s2 }
  0x14   :  { %p293_p5 = scmp.ne.s32.totalorder %s231_s2, %s292_s26  ;;  %p298_p7 = scmp.lt.s32.totalorder %s292_s26, %s292_s26 }
  0x16   :  { %p299_p8 = por %p298_p7, %p297_p6 }
  0x17   :  { %212 = vperm.xlu0 %267, %v200_v7   ;;  %v36_v15 = vld [vmem:[#allocation2] sm:$0x1] }
  0x18   :  { %v37_v16 = vld [vmem:[#allocation2 + $0x1] sm:$0x1]  ;;  %p300_p9 = pnand %p299_p8, %p293_p5 }
  0x8e   :  { %v204_v10 = vpop.permute.xlu0 %203 }
  0x8f   :  { %v209_v13 = vrot.slane %v204_v10, %v208_v11 }
  0x91   :  { %268 = vrcp.f32 %v209_v13 }
  0x92   :  { %v213_v12 = vpop.permute.xlu0 %212 }
  0x93   :  { %v218_v14 = vrot.slane %v213_v12, %v208_v11 }
  0x95   :  { %270 = vrcp.f32 %v218_v14 }
  0x9e   :  { %v269_v23 = vpop.eup %268 }
  0xa2   :  { %v271_v24 = vpop.eup %270 }
  0xd2   :  { %v112_v17 = vpop.f32.mrf.mxu0 }
  0xd3   :  { %v185_v18 = vpop.f32.mrf.mxu1  ;;  %v189_v19 = vadd.f32 %v112_v17, %v36_v15 }
  0xd4   :  { %v190_v20 = vadd.f32 %v185_v18, %v37_v16  ;;  %v252_v21 = vpop.f32.mrf.mxu0 }
  0xd5   :  { %v257_v22 = vpop.f32.mrf.mxu1  ;;  %192 = vst.msk [vmem:[#allocation2] sm:$0x1] %vm33_vm2, %v189_v19 }
  0xd6   :  { %193 = vst.msk [vmem:[#allocation2 + $0x1] sm:$0x1] %vm33_vm2, %v190_v20 }
  0xdc   :  { %v197_v25 = vld [vmem:[#allocation2] sm:$0x1] }
  0xdd   :  { %v198_v26 = vld [vmem:[#allocation2 + $0x1] sm:$0x1]  ;;  %v220_v27 = vmul.f32 %v269_v23, %v197_v25 }
  0xde   :  { %v222_v28 = vmul.f32 %v271_v24, %v198_v26 }
  0xdf   :  { %223 = vst.msk [vmem:[#allocation6] sm:$0x1] %vm33_vm2, %v220_v27 }
  0xe0   :  { %224 = vst.msk [vmem:[#allocation6 + $0x1] sm:$0x1] %vm33_vm2, %v222_v28 }
  0xe1   :  { %303 = shalt.err (!%p300_p9)
}
  0xe2   :  { %s323_s27 = smov 16   ;;  %s324_s28 = smov 1  }
  0xe3   :  { %236 = dma.vmem_to_hbm [thread:$0]  %s231_s2, 32, %s372_s3, [#allocation5], %s323_s27, %s323_s27, %s324_s28  }
  0xe4   :  { %314 = dma.done.wait [#allocation5], 32  }
  0xe5   :  { %315 = vsyncadd [#allocation5], 4294967264 }
  0xe6   :  { %240 = vsyncpa [#allocation4], 1 }
  0xe7   :  { %241 = vsyncpa [#allocation5], 1 }

</bundles_post_ra>
